<compile_context>
chip_gen: v5e
topology: v5e:2x2
jax: 0.10.0
libtpu: 0.0.40
codegen_flags: <defaults>
</compile_context>

<pallas_src>
import functools

import jax
import jax.numpy as jnp
from jax import lax
from jax.experimental import pallas as pl
from jax.experimental.pallas import tpu as pltpu


def aroma_linear_kernel(x_ref, w_ref, a_ref, bt_ref, bias_ref, o_ref,
                        acc_ref, xa_ref, *, scale):
    # x_ref:   (tm, tk)   input tile
    # w_ref:   (tn, tk)   frozen base weight tile (PyTorch [out, in] layout)
    # a_ref:   (r,  tk)   lora_A tile ([r, in] layout)
    # bt_ref:  (r,  tn)   lora_B.T tile (lane-dense [r, out] layout)
    # bias_ref:(1,  tn)   bias tile (f32)
    # o_ref:   (tm, tn)   output tile
    # acc_ref: (tm, tn)   f32 base accumulator (scratch)
    # xa_ref:  (tm, r)    f32 LoRA-A accumulator (scratch)
    k = pl.program_id(2)

    @pl.when(k == 0)
    def _init():
        acc_ref[...] = jnp.zeros_like(acc_ref)
        xa_ref[...] = jnp.zeros_like(xa_ref)

    x = x_ref[...]
    # Contract last dims of both operands (no .T materialization).
    dn = (((1,), (1,)), ((), ()))
    acc_ref[...] += lax.dot_general(x, w_ref[...], dn,
                                    preferred_element_type=jnp.float32)
    xa_ref[...] += lax.dot_general(x, a_ref[...], dn,
                                   preferred_element_type=jnp.float32)

    @pl.when(k == pl.num_programs(2) - 1)
    def _finalize():
        # Fold scale into the tiny (tm, r) intermediate, not the (tm, tn) result.
        xa_scaled = (xa_ref[...] * scale).astype(bt_ref.dtype)
        lora = jnp.dot(xa_scaled, bt_ref[...],
                       preferred_element_type=jnp.float32)
        o_ref[...] = (acc_ref[...] + bias_ref[...] + lora).astype(o_ref.dtype)


def _round_up(x, m):
    return pl.cdiv(x, m) * m


def aroma_linear_forward(x, weight, bias, lora_A, lora_B, *, lora_alpha, r,
                         tm=256, tn=256, tk=512):
    """x: [batch, seq, in_features] -> [batch, seq, out_features]."""
    batch, seq, in_features = x.shape
    out_features = weight.shape[0]
    M = batch * seq
    scale = lora_alpha / r

    # Tile sizing: N/K tiles must divide the feature dims (fall back to the
    # full dim if not); M tile is clamped for tiny inputs and M is padded.
    tn = min(tn, out_features)
    if out_features % tn:
        tn = out_features
    tk = min(tk, in_features)
    if in_features % tk:
        tk = in_features
    tm = min(tm, _round_up(M, 8))
    Mp = _round_up(M, tm)

    x2d = x.reshape(M, in_features)
    if Mp != M:
        x2d = jnp.pad(x2d, ((0, Mp - M), (0, 0)))

    bias2d = bias.reshape(1, out_features).astype(jnp.float32)
    lora_Bt = lora_B.T  # [r, out]: lane-dense operand for the second LoRA matmul

    grid = (Mp // tm, out_features // tn, in_features // tk)

    out2d = pl.pallas_call(
        functools.partial(aroma_linear_kernel, scale=scale),
        out_shape=jax.ShapeDtypeStruct((Mp, out_features), x.dtype),
        grid_spec=pltpu.PrefetchScalarGridSpec(
            num_scalar_prefetch=0,
            grid=grid,
            in_specs=[
                pl.BlockSpec((tm, tk), lambda i, j, k: (i, k)),   # x
                pl.BlockSpec((tn, tk), lambda i, j, k: (j, k)),   # W  [out, in]
                pl.BlockSpec((r, tk), lambda i, j, k: (0, k)),    # A  [r, in]
                pl.BlockSpec((r, tn), lambda i, j, k: (0, j)),    # B.T [r, out]
                pl.BlockSpec((1, tn), lambda i, j, k: (0, j)),    # bias
            ],
            out_specs=pl.BlockSpec((tm, tn), lambda i, j, k: (i, j)),
            scratch_shapes=[
                pltpu.VMEM((tm, tn), jnp.float32),   # base accumulator
                pltpu.VMEM((tm, r), jnp.float32),    # xa accumulator
            ],
        ),
        compiler_params=pltpu.CompilerParams(
            dimension_semantics=("parallel", "parallel", "arbitrary"),
            vmem_limit_bytes=64 * 1024 * 1024,
        ),
    )(x2d, weight, lora_A, lora_Bt, bias2d)

    if Mp != M:
        out2d = out2d[:M]
    return out2d.reshape(batch, seq, out_features)


def reference_forward(x, weight, bias, lora_A, lora_B, *, lora_alpha, r):
    scale = lora_alpha / r
    base = jnp.einsum("bsi,oi->bso", x, weight) + bias
    lora = jnp.einsum("bsr,or->bso",
                      jnp.einsum("bsi,ri->bsr", x, lora_A), lora_B)
    return base + lora * scale


if __name__ == "__main__":
    # Small shapes consistent with the module: a linear layer applied over
    # [batch, seq, in_features].
    batch, seq = 2, 8
    in_features, out_features, r = 256, 256, 16
    lora_alpha = 2

    key = jax.random.PRNGKey(0)
    kx, kw, kb, ka, kbw = jax.random.split(key, 5)

    # The module's __init__ uses zeros for the base weight / lora_B (which
    # would make the output trivially bias-only), so we use deterministic
    # random values of the same shapes to exercise the math.
    x = jax.random.normal(kx, (batch, seq, in_features), jnp.float32)
    weight = jax.random.normal(kw, (out_features, in_features), jnp.float32) * 0.02
    bias = jax.random.normal(kb, (out_features,), jnp.float32) * 0.01
    lora_A = jax.random.normal(ka, (r, in_features), jnp.float32) * 0.05
    lora_B = jax.random.normal(kbw, (out_features, r), jnp.float32) * 0.05

    # TODO(synk): training-mode lora_dropout (p=0.1) not implemented; eval-mode
    # (identity) semantics are used, matching module.eval().

    out = aroma_linear_forward(x, weight, bias, lora_A, lora_B,
                               lora_alpha=lora_alpha, r=r)
    out = jax.block_until_ready(out)

    ref = reference_forward(x, weight, bias, lora_A, lora_B,
                            lora_alpha=lora_alpha, r=r)
    assert out.shape == (batch, seq, out_features)
    assert jnp.allclose(out, ref, atol=2e-4, rtol=2e-4), "mismatch vs reference"

    print("KERNEL_OK")
</pallas_src>

<mosaic_0001>
module attributes {stable_mosaic.version = 11 : i64} {
  func.func @aroma_linear_kernel(%arg0: i32, %arg1: i32, %arg2: i32, %arg3: memref<16x256xf32, #tpu.memory_space<vmem>>, %arg4: memref<256x256xf32, #tpu.memory_space<vmem>>, %arg5: memref<16x256xf32, #tpu.memory_space<vmem>>, %arg6: memref<16x256xf32, #tpu.memory_space<vmem>>, %arg7: memref<1x256xf32, #tpu.memory_space<vmem>>, %arg8: memref<16x256xf32, #tpu.memory_space<vmem>>, %arg9: memref<16x256xf32, #tpu.memory_space<vmem>>, %arg10: memref<16x16xf32, #tpu.memory_space<vmem>>) attributes {dimension_semantics = [#tpu.dimension_semantics<parallel>, #tpu.dimension_semantics<parallel>, #tpu.dimension_semantics<arbitrary>], iteration_bounds = array<i64: 1, 1, 1>, scalar_prefetch = 0 : i64, scratch_operands = 2 : i64, tpu.core_type = #tpu.core_type<tc>, window_params = [{transform_indices = @transform_0, window_bounds = array<i64: 16, 256>}, {transform_indices = @transform_1, window_bounds = array<i64: 256, 256>}, {transform_indices = @transform_2, window_bounds = array<i64: 16, 256>}, {transform_indices = @transform_3, window_bounds = array<i64: 16, 256>}, {transform_indices = @transform_4, window_bounds = array<i64: 1, 256>}, {transform_indices = @transform_5, window_bounds = array<i64: 16, 256>}]} {
    %c0_i32 = arith.constant 0 : i32
    %0 = arith.cmpi eq, %arg2, %c0_i32 : i32
    %1 = arith.extui %0 : i1 to i32
    %c0_i32_0 = arith.constant 0 : i32
    %2 = arith.cmpi ne, %1, %c0_i32_0 : i32
    scf.if %2 {
      %cst_17 = arith.constant 0.000000e+00 : f32
      %17 = vector.broadcast %cst_17 : f32 to vector<16x256xf32>
      %c0_18 = arith.constant 0 : index
      %c0_19 = arith.constant 0 : index
      %18 = vector.load %arg9[%c0_18, %c0_19] : memref<16x256xf32, #tpu.memory_space<vmem>>, vector<16x256xf32>
      tpu.vector_store %arg9[%c0_18, %c0_19], %17 {strides = array<i32>} : memref<16x256xf32, #tpu.memory_space<vmem>>, vector<16x256xf32>,
      %cst_20 = arith.constant 0.000000e+00 : f32
      %19 = vector.broadcast %cst_20 : f32 to vector<16x16xf32>
      %c0_21 = arith.constant 0 : index
      %c0_22 = arith.constant 0 : index
      %20 = vector.load %arg10[%c0_21, %c0_22] : memref<16x16xf32, #tpu.memory_space<vmem>>, vector<16x16xf32>
      tpu.vector_store %arg10[%c0_21, %c0_22], %19 {strides = array<i32>} : memref<16x16xf32, #tpu.memory_space<vmem>>, vector<16x16xf32>,
    } else {
    }
    %c0 = arith.constant 0 : index
    %c0_1 = arith.constant 0 : index
    %3 = vector.load %arg3[%c0, %c0_1] : memref<16x256xf32, #tpu.memory_space<vmem>>, vector<16x256xf32>
    %c0_2 = arith.constant 0 : index
    %c0_3 = arith.constant 0 : index
    %4 = vector.load %arg9[%c0_2, %c0_3] : memref<16x256xf32, #tpu.memory_space<vmem>>, vector<16x256xf32>
    %c0_4 = arith.constant 0 : index
    %c0_5 = arith.constant 0 : index
    %5 = vector.load %arg4[%c0_4, %c0_5] : memref<256x256xf32, #tpu.memory_space<vmem>>, vector<256x256xf32>
    %cst = arith.constant dense<0.000000e+00> : vector<16x256xf32>
    %6 = tpu.matmul %3, %5, %cst {dimension_numbers = #tpu.dot_dimension_numbers<[1], [1], [0], [0], [0, 0, 1, 0], [], []>} : vector<16x256xf32>, vector<256x256xf32>, vector<16x256xf32> -> vector<16x256xf32>
    %7 = arith.addf %4, %6 : vector<16x256xf32>
    %c0_6 = arith.constant 0 : index
    %c0_7 = arith.constant 0 : index
    %8 = vector.load %arg9[%c0_6, %c0_7] : memref<16x256xf32, #tpu.memory_space<vmem>>, vector<16x256xf32>
    tpu.vector_store %arg9[%c0_6, %c0_7], %7 {strides = array<i32>} : memref<16x256xf32, #tpu.memory_space<vmem>>, vector<16x256xf32>,
    %c0_8 = arith.constant 0 : index
    %c0_9 = arith.constant 0 : index
    %9 = vector.load %arg10[%c0_8, %c0_9] : memref<16x16xf32, #tpu.memory_space<vmem>>, vector<16x16xf32>
    %c0_10 = arith.constant 0 : index
    %c0_11 = arith.constant 0 : index
    %10 = vector.load %arg5[%c0_10, %c0_11] : memref<16x256xf32, #tpu.memory_space<vmem>>, vector<16x256xf32>
    %cst_12 = arith.constant dense<0.000000e+00> : vector<16x16xf32>
    %11 = tpu.matmul %3, %10, %cst_12 {dimension_numbers = #tpu.dot_dimension_numbers<[1], [1], [0], [0], [0, 0, 1, 0], [], []>} : vector<16x256xf32>, vector<16x256xf32>, vector<16x16xf32> -> vector<16x16xf32>
    %12 = arith.addf %9, %11 : vector<16x16xf32>
    %c0_13 = arith.constant 0 : index
    %c0_14 = arith.constant 0 : index
    %13 = vector.load %arg10[%c0_13, %c0_14] : memref<16x16xf32, #tpu.memory_space<vmem>>, vector<16x16xf32>
    tpu.vector_store %arg10[%c0_13, %c0_14], %12 {strides = array<i32>} : memref<16x16xf32, #tpu.memory_space<vmem>>, vector<16x16xf32>,
    %c0_i32_15 = arith.constant 0 : i32
    %14 = arith.cmpi eq, %arg2, %c0_i32_15 : i32
    %15 = arith.extui %14 : i1 to i32
    %c0_i32_16 = arith.constant 0 : i32
    %16 = arith.cmpi ne, %15, %c0_i32_16 : i32
    scf.if %16 {
      %c0_17 = arith.constant 0 : index
      %c0_18 = arith.constant 0 : index
      %17 = vector.load %arg10[%c0_17, %c0_18] : memref<16x16xf32, #tpu.memory_space<vmem>>, vector<16x16xf32>
      %cst_19 = arith.constant 1.250000e-01 : f32
      %18 = vector.broadcast %cst_19 : f32 to vector<16x16xf32>
      %19 = arith.mulf %17, %18 : vector<16x16xf32>
      %c0_20 = arith.constant 0 : index
      %c0_21 = arith.constant 0 : index
      %20 = vector.load %arg6[%c0_20, %c0_21] : memref<16x256xf32, #tpu.memory_space<vmem>>, vector<16x256xf32>
      %cst_22 = arith.constant dense<0.000000e+00> : vector<16x256xf32>
      %21 = tpu.matmul %19, %20, %cst_22 {dimension_numbers = #tpu.dot_dimension_numbers<[1], [0], [0], [1], [0, 0, 1, 1], [], []>} : vector<16x16xf32>, vector<16x256xf32>, vector<16x256xf32> -> vector<16x256xf32>
      %c0_23 = arith.constant 0 : index
      %c0_24 = arith.constant 0 : index
      %22 = vector.load %arg9[%c0_23, %c0_24] : memref<16x256xf32, #tpu.memory_space<vmem>>, vector<16x256xf32>
      %c0_25 = arith.constant 0 : index
      %c0_26 = arith.constant 0 : index
      %23 = vector.load %arg7[%c0_25, %c0_26] : memref<1x256xf32, #tpu.memory_space<vmem>>, vector<1x256xf32>
      %24 = vector.broadcast %23 : vector<1x256xf32> to vector<16x256xf32>
      %25 = arith.addf %22, %24 : vector<16x256xf32>
      %26 = arith.addf %25, %21 : vector<16x256xf32>
      %c0_27 = arith.constant 0 : index
      %c0_28 = arith.constant 0 : index
      %27 = vector.load %arg8[%c0_27, %c0_28] : memref<16x256xf32, #tpu.memory_space<vmem>>, vector<16x256xf32>
      tpu.vector_store %arg8[%c0_27, %c0_28], %26 {strides = array<i32>} : memref<16x256xf32, #tpu.memory_space<vmem>>, vector<16x256xf32>,
    } else {
    }
    return
  }
  func.func @transform_0(%arg0: i32, %arg1: i32, %arg2: i32) -> (i32, i32) {
    %c0_i32 = arith.constant 0 : i32
    return %arg0, %arg2 : i32, i32
  }
  func.func @transform_1(%arg0: i32, %arg1: i32, %arg2: i32) -> (i32, i32) {
    %c0_i32 = arith.constant 0 : i32
    return %arg1, %arg2 : i32, i32
  }
  func.func @transform_2(%arg0: i32, %arg1: i32, %arg2: i32) -> (i32, i32) {
    %c0_i32 = arith.constant 0 : i32
    %c0_i32_0 = arith.constant 0 : i32
    return %c0_i32, %arg2 : i32, i32
  }
  func.func @transform_3(%arg0: i32, %arg1: i32, %arg2: i32) -> (i32, i32) {
    %c0_i32 = arith.constant 0 : i32
    %c0_i32_0 = arith.constant 0 : i32
    return %c0_i32, %arg1 : i32, i32
  }
  func.func @transform_4(%arg0: i32, %arg1: i32, %arg2: i32) -> (i32, i32) {
    %c0_i32 = arith.constant 0 : i32
    %c0_i32_0 = arith.constant 0 : i32
    return %c0_i32, %arg1 : i32, i32
  }
  func.func @transform_5(%arg0: i32, %arg1: i32, %arg2: i32) -> (i32, i32) {
    %c0_i32 = arith.constant 0 : i32
    return %arg0, %arg1 : i32, i32
  }
}

</mosaic_0001>

<bundles_post_ra>
// kernel: tpu_custom_call.1
= control target key start
LH: loop header
LB: loop body
LE: loop exit
PB: predicated region body
PF: predicated region fallthrough
CT: control target
= control target key end

     0   :  { %10 = vsyncpa [#allocation5], 0  ;;  %s669_s0 = inlined_call_operand.hbm [shape: f32[16,256], index: 0, kind: input, shape index: {}]   ;;  %s670_s1 = inlined_call_operand.hbm [shape: f32[256,256], index: 1, kind: input, shape index: {}]   ;;  %s671_s2 = inlined_call_operand.hbm [shape: f32[16,256], index: 2, kind: input, shape index: {}]   ;;  %s672_s3 = inlined_call_operand.hbm [shape: f32[16,256], index: 3, kind: input, shape index: {}]   ;;  %s673_s4 = inlined_call_operand.vmem [shape: f32[1,256], index: 4, kind: input, shape index: {}]   ;;  %s674_s5 = inlined_call_operand.hbm [shape: f32[16,256], index: 5, kind: output, shape index: {}]  }
   0x1   :  { %11 = vsyncpa [#allocation8], 0 }
   0x2   :  { %12 = vsyncpa [#allocation11], 0 }
   0x3   :  { %13 = vsyncpa [#allocation6], 0  ;;  %s31_s20 = sshll.u32 %s670_s1, 4  ;;  %s570_s21 = smov [#allocation7]   ;;  %s32_s20 = int_to_ptr.hbm [resolvable:$true] %s31_s20 }
   0x4   :  { %s33_s22 = sshll.u32 %s570_s21, 4  ;;  %s18_s25 = sshll.u32 %s669_s0, 4  ;;  %s34_s22 = int_to_ptr.vmem [resolvable:$true] %s33_s22  ;;  %s19_s25 = int_to_ptr.hbm [resolvable:$true] %s18_s25 }
   0x5   :  { %s571_s26 = smov 256   ;;  %s572_s27 = smov 16  }
   0x6   :  { %39 = dma.hbm_to_vmem [thread:$0]  %s32_s20, 8192, %s34_s22, [#allocation8], %s571_s26, %s571_s26, %s572_s27  }
   0x7   :  { %s573_s28 = smov [#allocation4]   ;;  %s44_s1 = sshll.u32 %s671_s2, 4  ;;  %s45_s1 = int_to_ptr.hbm [resolvable:$true] %s44_s1 }
   0x8   :  { %s20_s29 = sshll.u32 %s573_s28, 4  ;;  %s57_s8 = sshll.u32 %s672_s3, 4  ;;  %s21_s29 = int_to_ptr.vmem [resolvable:$true] %s20_s29  ;;  %s58_s8 = int_to_ptr.hbm [resolvable:$true] %s57_s8 }
   0x9   :  { %26 = dma.hbm_to_vmem [thread:$0]  %s19_s25, 512, %s21_s29, [#allocation5], %s571_s26, %s571_s26, %s572_s27  }
   0xa   :  { %s574_s9 = smov [#allocation9]   ;;  %s575_s11 = smov [#allocation10]  }
   0xb   :  { %s46_s10 = sshll.u32 %s574_s9, 4  ;;  %s59_s2 = sshll.u32 %s575_s11, 4  ;;  %s47_s10 = int_to_ptr.vmem [resolvable:$true] %s46_s10  ;;  %s60_s2 = int_to_ptr.vmem [resolvable:$true] %s59_s2 }
   0xc   :  { %52 = dma.hbm_to_vmem [thread:$0]  %s45_s1, 512, %s47_s10, [#allocation8], %s571_s26, %s571_s26, %s572_s27  }
   0xd   :  { %65 = dma.hbm_to_vmem [thread:$0]  %s58_s8, 512, %s60_s2, [#allocation11], %s571_s26, %s571_s26, %s572_s27  }
   0xe   :  { %562 = dma.done.wait [#allocation5], 512  }
   0xf   :  { %563 = vsyncadd [#allocation5], 4294966784 }
  0x10   :  { %564 = dma.done.wait [#allocation8], 8704  }
  0x11   :  { %565 = vsyncadd [#allocation8], 4294958592 }
  0x12   :  { %566 = dma.done.wait [#allocation11], 512  }
  0x13   :  { %567 = vsyncadd [#allocation11], 4294966784  ;;  %v133_v0 = vld [vmem:[#allocation7 + $0xf0] sm:$0xff]  ;;  %v134_v1 = vld [vmem:[#allocation7 + $0xf8] sm:$0xff]  ;;  %vm92_vm0 = vcmask 130048   ;;  %s577_s13 = smov [#allocation12]  }
  0x14   :  { %167 = vmatpush.xpose.msra.mxu0 %v133_v0  ;;  %190 = vmatpush.xpose.msra.mxu1 %v134_v1  ;;  %v131_v2 = vld [vmem:[#allocation7 + $0xe0] sm:$0xff]  ;;  %v132_v3 = vld [vmem:[#allocation7 + $0xe8] sm:$0xff]  ;;  %v129_v4 = vld [vmem:[#allocation7 + $0xd0] sm:$0xff]  ;;  %s413_s14 = sshll.u32 %s577_s13, 4  ;;  %s414_s14 = int_to_ptr.vmem [resolvable:$true] %s413_s14 }
  0x15   :  { %v130_v5 = vld [vmem:[#allocation7 + $0xd8] sm:$0xff]  ;;  %v127_v6 = vld [vmem:[#allocation7 + $0xc0] sm:$0xff]  ;;  %v128_v7 = vld [vmem:[#allocation7 + $0xc8] sm:$0xff] }
  0x16   :  { %v125_v8 = vld [vmem:[#allocation7 + $0xb0] sm:$0xff]  ;;  %v126_v9 = vld [vmem:[#allocation7 + $0xb8] sm:$0xff]  ;;  %v123_v10 = vld [vmem:[#allocation7 + $0xa0] sm:$0xff] }
  0x17   :  { %v124_v11 = vld [vmem:[#allocation7 + $0xa8] sm:$0xff]  ;;  %v121_v12 = vld [vmem:[#allocation7 + $0x90] sm:$0xff]  ;;  %v122_v13 = vld [vmem:[#allocation7 + $0x98] sm:$0xff] }
  0x18   :  { %168 = vmatpush.xpose.msra.mxu0 %v131_v2  ;;  %191 = vmatpush.xpose.msra.mxu1 %v132_v3  ;;  %v119_v14 = vld [vmem:[#allocation7 + $0x80] sm:$0xff]  ;;  %v120_v15 = vld [vmem:[#allocation7 + $0x88] sm:$0xff]  ;;  %v117_v16 = vld [vmem:[#allocation7 + $0x70] sm:$0xff] }
  0x19   :  { %v118_v17 = vld [vmem:[#allocation7 + $0x78] sm:$0xff]  ;;  %v115_v18 = vld [vmem:[#allocation7 + $0x60] sm:$0xff]  ;;  %v116_v19 = vld [vmem:[#allocation7 + $0x68] sm:$0xff] }
  0x1a   :  { %v113_v20 = vld [vmem:[#allocation7 + $0x50] sm:$0xff]  ;;  %v114_v21 = vld [vmem:[#allocation7 + $0x58] sm:$0xff]  ;;  %v111_v22 = vld [vmem:[#allocation7 + $0x40] sm:$0xff] }
  0x1b   :  { %v112_v23 = vld [vmem:[#allocation7 + $0x48] sm:$0xff]  ;;  %v109_v24 = vld [vmem:[#allocation7 + $0x30] sm:$0xff]  ;;  %v110_v25 = vld [vmem:[#allocation7 + $0x38] sm:$0xff] }
  0x1c   :  { %169 = vmatpush.xpose.msra.mxu0 %v129_v4  ;;  %192 = vmatpush.xpose.msra.mxu1 %v130_v5  ;;  %v107_v26 = vld [vmem:[#allocation7 + $0x20] sm:$0xff]  ;;  %v108_v27 = vld [vmem:[#allocation7 + $0x28] sm:$0xff]  ;;  %v105_v28 = vld [vmem:[#allocation7 + $0x10] sm:$0xff] }
  0x1d   :  { %v106_v29 = vld [vmem:[#allocation7 + $0x18] sm:$0xff]  ;;  %v165_v30 = vld [vmem:[#allocation7 + $0x1f0] sm:$0xff]  ;;  %v103_v32 = vld [vmem:[#allocation7] sm:$0xff] }
  0x1e   :  { %v166_v31 = vld [vmem:[#allocation7 + $0x1f8] sm:$0xff]  ;;  %v104_v33 = vld [vmem:[#allocation7 + $0x8] sm:$0xff]  ;;  %213 = vmatpush.xpose.msra.mxu2 %v165_v30  ;;  %v271_v34 = vld [vmem:[#allocation9 + $0x10] sm:$0xff] }
  0x1f   :  { %236 = vmatpush.xpose.msra.mxu3 %v166_v31  ;;  %v272_v35 = vld [vmem:[#allocation9 + $0x18] sm:$0xff]  ;;  %v163_v36 = vld [vmem:[#allocation7 + $0x1e0] sm:$0xff]  ;;  %v164_v37 = vld [vmem:[#allocation7 + $0x1e8] sm:$0xff] }
  0x20   :  { %170 = vmatpush.xpose.msra.mxu0 %v127_v6  ;;  %193 = vmatpush.xpose.msra.mxu1 %v128_v7  ;;  %v632_v38 = vld [vmem:[#allocation4] sm:$0xff]  ;;  %v634_v39 = vld [vmem:[#allocation4 + $0x8] sm:$0xff]  ;;  %v161_v42 = vld [vmem:[#allocation7 + $0x1d0] sm:$0xff] }
  0x21   :  { %v269_v40 = vld [vmem:[#allocation9] sm:$0xff]  ;;  %v270_v41 = vld [vmem:[#allocation9 + $0x8] sm:$0xff]  ;;  %v162_v43 = vld [vmem:[#allocation7 + $0x1d8] sm:$0xff] }
  0x22   :  { %214 = vmatpush.xpose.msra.mxu2 %v163_v36  ;;  %v159_v44 = vld [vmem:[#allocation7 + $0x1c0] sm:$0xff]  ;;  %v160_v45 = vld [vmem:[#allocation7 + $0x1c8] sm:$0xff]  ;;  %v638_v46 = vld [vmem:[#allocation4 + $0x10] sm:$0xff] }
  0x23   :  { %237 = vmatpush.xpose.msra.mxu3 %v164_v37  ;;  %v640_v47 = vld [vmem:[#allocation4 + $0x18] sm:$0xff]  ;;  %v157_v48 = vld [vmem:[#allocation7 + $0x1b0] sm:$0xff]  ;;  %v155_v50 = vld [vmem:[#allocation7 + $0x1a0] sm:$0xff] }
  0x24   :  { %171 = vmatpush.xpose.msra.mxu0 %v125_v8  ;;  %194 = vmatpush.xpose.msra.mxu1 %v126_v9  ;;  %v158_v49 = vld [vmem:[#allocation7 + $0x1b8] sm:$0xff]  ;;  %v156_v51 = vld [vmem:[#allocation7 + $0x1a8] sm:$0xff]  ;;  %v153_v52 = vld [vmem:[#allocation7 + $0x190] sm:$0xff] }
  0x25   :  { %v154_v53 = vld [vmem:[#allocation7 + $0x198] sm:$0xff]  ;;  %v151_v54 = vld [vmem:[#allocation7 + $0x180] sm:$0xff]  ;;  %v152_v55 = vld [vmem:[#allocation7 + $0x188] sm:$0xff] }
  0x26   :  { %215 = vmatpush.xpose.msra.mxu2 %v161_v42  ;;  %v149_v56 = vld [vmem:[#allocation7 + $0x170] sm:$0xff]  ;;  %v150_v57 = vld [vmem:[#allocation7 + $0x178] sm:$0xff]  ;;  %v147_v58 = vld [vmem:[#allocation7 + $0x160] sm:$0xff] }
  0x27   :  { %238 = vmatpush.xpose.msra.mxu3 %v162_v43  ;;  %v148_v59 = vld [vmem:[#allocation7 + $0x168] sm:$0xff]  ;;  %v145_v60 = vld [vmem:[#allocation7 + $0x150] sm:$0xff]  ;;  %v146_v61 = vld [vmem:[#allocation7 + $0x158] sm:$0xff] }
  0x28   :  { %172 = vmatpush.xpose.msra.mxu0 %v123_v10  ;;  %195 = vmatpush.xpose.msra.mxu1 %v124_v11  ;;  %v143_v62 = vld [vmem:[#allocation7 + $0x140] sm:$0xff]  ;;  %v144_v63 = vld [vmem:[#allocation7 + $0x148] sm:$0xff]  ;;  %v141_v0 = vld [vmem:[#allocation7 + $0x130] sm:$0xff]  ;;  %v576_v10 = vmov 0.0  }
  0x29   :  { %v142_v1 = vld [vmem:[#allocation7 + $0x138] sm:$0xff]  ;;  %v139_v2 = vld [vmem:[#allocation7 + $0x120] sm:$0xff]  ;;  %v140_v3 = vld [vmem:[#allocation7 + $0x128] sm:$0xff]  ;;  %93 = vst.msk [vmem:[#allocation3] sm:$0xff] %vm92_vm0, %v576_v10 }
  0x2a   :  { %216 = vmatpush.xpose.msra.mxu2 %v159_v44  ;;  %v137_v4 = vld [vmem:[#allocation7 + $0x110] sm:$0xff]  ;;  %v138_v5 = vld [vmem:[#allocation7 + $0x118] sm:$0xff]  ;;  %v135_v6 = vld [vmem:[#allocation7 + $0x100] sm:$0xff]  ;;  %94 = vst.msk [vmem:[#allocation3 + $0x8] sm:$0xff] %vm92_vm0, %v576_v10 }
  0x2b   :  { %239 = vmatpush.xpose.msra.mxu3 %v160_v45  ;;  %v136_v7 = vld [vmem:[#allocation7 + $0x108] sm:$0xff]  ;;  %v333_v8 = vld [vmem:[#allocation10 + $0x10] sm:$0xff]  ;;  %v334_v9 = vld [vmem:[#allocation10 + $0x18] sm:$0xff] }
  0x2c   :  { %173 = vmatpush.xpose.msra.mxu0 %v121_v12  ;;  %196 = vmatpush.xpose.msra.mxu1 %v122_v13  ;;  %v331_v11 = vld [vmem:[#allocation10] sm:$0xff]  ;;  %v332_v12 = vld [vmem:[#allocation10 + $0x8] sm:$0xff]  ;;  %v391_v37 = vld [vmem:[%s673_s4] sm:$0x3]  ;;  %s415_s4 = sshll.u32 %s674_s5, 4  ;;  %s416_s4 = int_to_ptr.hbm [resolvable:$true] %s415_s4 }
  0x2e   :  { %217 = vmatpush.xpose.msra.mxu2 %v157_v48 }
  0x2f   :  { %240 = vmatpush.xpose.msra.mxu3 %v158_v49 }
  0x30   :  { %174 = vmatpush.xpose.msra.mxu0 %v119_v14  ;;  %197 = vmatpush.xpose.msra.mxu1 %v120_v15 }
  0x32   :  { %218 = vmatpush.xpose.msra.mxu2 %v155_v50 }
  0x33   :  { %241 = vmatpush.xpose.msra.mxu3 %v156_v51 }
  0x34   :  { %175 = vmatpush.xpose.msra.mxu0 %v117_v16  ;;  %198 = vmatpush.xpose.msra.mxu1 %v118_v17 }
  0x36   :  { %219 = vmatpush.xpose.msra.mxu2 %v153_v52 }
  0x37   :  { %242 = vmatpush.xpose.msra.mxu3 %v154_v53 }
  0x38   :  { %176 = vmatpush.xpose.msra.mxu0 %v115_v18  ;;  %199 = vmatpush.xpose.msra.mxu1 %v116_v19 }
  0x3a   :  { %220 = vmatpush.xpose.msra.mxu2 %v151_v54 }
  0x3b   :  { %243 = vmatpush.xpose.msra.mxu3 %v152_v55 }
  0x3c   :  { %177 = vmatpush.xpose.msra.mxu0 %v113_v20  ;;  %200 = vmatpush.xpose.msra.mxu1 %v114_v21  ;;  %v267_v20 = vld [vmem:[#allocation3] sm:$0xff] }
  0x3e   :  { %221 = vmatpush.xpose.msra.mxu2 %v149_v56 }
  0x3f   :  { %244 = vmatpush.xpose.msra.mxu3 %v150_v57 }
  0x40   :  { %178 = vmatpush.xpose.msra.mxu0 %v111_v22  ;;  %201 = vmatpush.xpose.msra.mxu1 %v112_v23 }
  0x42   :  { %222 = vmatpush.xpose.msra.mxu2 %v147_v58 }
  0x43   :  { %245 = vmatpush.xpose.msra.mxu3 %v148_v59 }
  0x44   :  { %179 = vmatpush.xpose.msra.mxu0 %v109_v24  ;;  %202 = vmatpush.xpose.msra.mxu1 %v110_v25  ;;  %v268_v25 = vld [vmem:[#allocation3 + $0x8] sm:$0xff] }
  0x46   :  { %223 = vmatpush.xpose.msra.mxu2 %v145_v60 }
  0x47   :  { %246 = vmatpush.xpose.msra.mxu3 %v146_v61 }
  0x48   :  { %180 = vmatpush.xpose.msra.mxu0 %v107_v26  ;;  %203 = vmatpush.xpose.msra.mxu1 %v108_v27 }
  0x4a   :  { %224 = vmatpush.xpose.msra.mxu2 %v143_v62 }
  0x4b   :  { %247 = vmatpush.xpose.msra.mxu3 %v144_v63 }
  0x4c   :  { %181 = vmatpush.xpose.msra.mxu0 %v105_v28  ;;  %204 = vmatpush.xpose.msra.mxu1 %v106_v29 }
  0x4e   :  { %225 = vmatpush.xpose.msra.mxu2 %v141_v0 }
  0x4f   :  { %248 = vmatpush.xpose.msra.mxu3 %v142_v1 }
  0x50   :  { %182 = vmatpush.xpose.msra.mxu0 %v103_v32  ;;  %205 = vmatpush.xpose.msra.mxu1 %v104_v33 }
  0x52   :  { %226 = vmatpush.xpose.msra.mxu2 %v139_v2 }
  0x53   :  { %183 = vmatmul.f32.vlgmr.msra.gmra.mxu0 %v632_v38  ;;  %206 = vmatmul.f32.vlgmr.msra.gmra.mxu1 %v634_v39 }
  0x54   :  { %287 = vmatpush.xpose.msrb.mxu0 %v271_v34  ;;  %310 = vmatpush.xpose.msrb.mxu1 %v272_v35 }
  0x55   :  { %249 = vmatpush.xpose.msra.mxu3 %v140_v3 }
  0x56   :  { %227 = vmatpush.xpose.msra.mxu2 %v137_v4 }
  0x58   :  { %288 = vmatpush.xpose.msrb.mxu0 %v269_v40  ;;  %311 = vmatpush.xpose.msrb.mxu1 %v270_v41  ;;  %v394_v40 = vperm.slane %v391_v37, 1 }
  0x59   :  { %250 = vmatpush.xpose.msra.mxu3 %v138_v5 }
  0x5a   :  { %228 = vmatpush.xpose.msra.mxu2 %v135_v6 }
  0x5b   :  { %186 = vmatmul.f32.gmra.mxu0 %v638_v46  ;;  %209 = vmatmul.f32.gmra.mxu1 %v640_v47 }
  0x5d   :  { %251 = vmatpush.xpose.msra.mxu3 %v136_v7  ;;  %229 = vmatmul.f32.vlgmr.msra.gmra.mxu2 %v632_v38 }
  0x5e   :  { %355 = vmatpush.msrb.mxu2 %v333_v8 }
  0x60   :  { %252 = vmatmul.f32.vlgmr.msra.gmra.mxu3 %v634_v39  ;;  %356 = vmatpush.msrb.mxu2 %v331_v11 }
  0x61   :  { %378 = vmatpush.msrb.mxu3 %v334_v9 }
  0x63   :  { %289 = vmatmul.f32.vlgmr.msrb.gmra.mxu0 %v632_v38  ;;  %312 = vmatmul.f32.vlgmr.msrb.gmra.mxu1 %v634_v39  ;;  %v393_v39 = vperm.slane %v391_v37, 0 }
  0x64   :  { %379 = vmatpush.msrb.mxu3 %v332_v12 }
  0x65   :  { %232 = vmatmul.f32.gmra.mxu2 %v638_v46 }
  0x68   :  { %255 = vmatmul.f32.gmra.mxu3 %v640_v47 }
  0x6b   :  { %292 = vmatmul.f32.gmra.mxu0 %v638_v46  ;;  %315 = vmatmul.f32.gmra.mxu1 %v640_v47 }
  0xd0   :  { %v184_v13 = vpop.f32.mrf.mxu0  ;;  %v207_v14 = vpop.f32.mrf.mxu1 }
  0xd1   :  { %v208_v15 = vadd.f32 %v207_v14, %v184_v13 }
  0xd3   :  { %v397_v41 = vadd.f32 %v393_v39, %v208_v15 }
  0xd8   :  { %v187_v16 = vpop.f32.mrf.mxu0  ;;  %v210_v17 = vpop.f32.mrf.mxu1 }
  0xd9   :  { %v211_v18 = vadd.f32 %v210_v17, %v187_v16 }
  0xdb   :  { %v399_v48 = vadd.f32 %v393_v39, %v211_v18 }
  0xe0   :  { %v290_v19 = vpop.f32.mrf.mxu0  ;;  %v313_v21 = vpop.f32.mrf.mxu1 }
  0xe1   :  { %v314_v22 = vadd.f32 %v313_v21, %v290_v19  ;;  %v230_v33 = vpop.f32.mrf.mxu2 }
  0xe3   :  { %v319_v23 = vadd.f32 %v314_v22, %v267_v20  ;;  %v253_v34 = vpop.f32.mrf.mxu3 }
  0xe4   :  { %v254_v38 = vadd.f32 %v253_v34, %v230_v33 }
  0xe5   :  { %322 = vst.msk [vmem:[#allocation3] sm:$0xff] %vm92_vm0, %v319_v23 }
  0xe6   :  { %v398_v42 = vadd.f32 %v394_v40, %v254_v38 }
  0xe8   :  { %v293_v24 = vpop.f32.mrf.mxu0  ;;  %v316_v26 = vpop.f32.mrf.mxu1 }
  0xe9   :  { %v317_v27 = vadd.f32 %v316_v26, %v293_v24  ;;  %v233_v35 = vpop.f32.mrf.mxu2 }
  0xeb   :  { %v320_v28 = vadd.f32 %v317_v27, %v268_v25  ;;  %v256_v36 = vpop.f32.mrf.mxu3 }
  0xec   :  { %v327_v29 = vld [vmem:[#allocation3] sm:$0xff]  ;;  %v257_v47 = vadd.f32 %v256_v36, %v233_v35 }
  0xed   :  { %323 = vst.msk [vmem:[#allocation3 + $0x8] sm:$0xff] %vm92_vm0, %v320_v28  ;;  %v329_v30 = vmul.f32 0.125, %v327_v29 }
  0xee   :  { %v400_v49 = vadd.f32 %v394_v40, %v257_v47 }
  0xef   :  { %430 = vmatmul.msk.f32.vlgmr.msrb.gmra.mxu2 %vm92_vm0, %v329_v30  ;;  %432 = vmatmul.msk.f32.vlgmr.msrb.gmra.mxu3 %vm92_vm0, %v329_v30 }
  0xf4   :  { %v328_v31 = vld [vmem:[#allocation3 + $0x8] sm:$0xff] }
  0xf5   :  { %v330_v32 = vmul.f32 0.125, %v328_v31 }
  0xf7   :  { %431 = vmatmul.msk.f32.gmra.mxu2 %vm92_vm0, %v330_v32  ;;  %433 = vmatmul.msk.f32.gmra.mxu3 %vm92_vm0, %v330_v32 }
 0x172   :  { %v358_v43 = vpop.f32.mrf.mxu2  ;;  %v381_v44 = vpop.f32.mrf.mxu3 }
 0x173   :  { %v401_v45 = vadd.f32 %v397_v41, %v358_v43  ;;  %v402_v46 = vadd.f32 %v398_v42, %v381_v44 }
 0x175   :  { %405 = vst [vmem:[#allocation12] sm:$0xff] %v401_v45 }
 0x176   :  { %406 = vst [vmem:[#allocation12 + $0x8] sm:$0xff] %v402_v46 }
 0x17a   :  { %v361_v50 = vpop.f32.mrf.mxu2  ;;  %v384_v51 = vpop.f32.mrf.mxu3 }
 0x17b   :  { %v403_v52 = vadd.f32 %v399_v48, %v361_v50  ;;  %v404_v53 = vadd.f32 %v400_v49, %v384_v51 }
 0x17d   :  { %407 = vst [vmem:[#allocation12 + $0x10] sm:$0xff] %v403_v52 }
 0x17e   :  { %408 = vst [vmem:[#allocation12 + $0x18] sm:$0xff] %v404_v53 }
 0x17f   :  { %421 = dma.vmem_to_hbm [thread:$0]  %s414_s14, 512, %s416_s4, [#allocation6], %s571_s26, %s571_s26, %s572_s27  }
 0x180   :  { %568 = dma.done.wait [#allocation6], 512  }
 0x181   :  { %569 = vsyncadd [#allocation6], 4294966784 }
 0x182   :  { %426 = vsyncpa [#allocation5], 1 }
 0x183   :  { %427 = vsyncpa [#allocation8], 1 }
 0x184   :  { %428 = vsyncpa [#allocation11], 1 }
 0x185   :  { %429 = vsyncpa [#allocation6], 1 }

</bundles_post_ra>
